<compile_context>
chip_gen: v5e
topology: v5e:2x2
jax: 0.10.0
libtpu: 0.0.40
codegen_flags: <defaults>
</compile_context>

<pallas_src>
import jax
import jax.numpy as jnp
from jax.experimental import pallas as pl
from jax.experimental.pallas import tpu as pltpu

EPS = 1e-09
TEMP = 0.66          # digit_temp; not used in the forward compute path
_NEG_BIG = -1e9      # pad-logit bias; exp(_NEG_BIG - m) == 0.0 in f32


def _round_up(x, m):
    return (x + m - 1) // m * m


def _choose_batch_tile(batch, num_samples, num_hidden, dp):
    """Returns (tile_rows, padded_batch).

    Small batches run as a single full-batch block. Larger batches are padded
    to a multiple of 128 and tiled so that (a) per-step VMEM (scales with
    S * TB) stays under ~12 MiB and (b) there are >= 2 grid steps (megacore
    sharding on v7x + DMA/compute pipelining everywhere).
    """
    if batch < 256:
        return batch, batch
    bp = _round_up(batch, 128)
    # Rough per-(sample,row) VMEM bytes: f32 z + bf16 copy, f32/bf16 h,
    # f32 logits (DP wide), logp/loss outputs, double-buffer slack.
    bytes_per_row = num_samples * (6 * num_hidden + 4 * dp + 256)
    budget = 12 * 1024 * 1024
    tb = 128
    for cand in (1024, 512, 256, 128):
        if bp % cand == 0 and bp // cand >= 2 and cand * bytes_per_row <= budget:
            tb = cand
            break
    return tb, bp


def _decoder_b_kernel(z_ref, w1_ref, b1_ref, w2_ref, b2_ref, lab_ref,
                      logp_ref, loss_ref):
    S, TB, Z = z_ref.shape
    D = logp_ref.shape[-1]          # real digit count (10)
    DP = w2_ref.shape[-1]           # lane-padded digit axis (128)

    # First GEMM + bias + ReLU. z arrives f32 and is cast to bf16 here
    # (keeps the standalone XLA cast pass out of the wrapper).
    z = z_ref[...].astype(jnp.bfloat16).reshape(S * TB, Z)
    h = jnp.dot(z, w1_ref[...], preferred_element_type=jnp.float32)
    h = jnp.maximum(h + b1_ref[...], 0.0)

    # Second GEMM + bias. Padded b2 entries are -1e9, so padded logits are
    # effectively masked out of the softmax below.
    logits = jnp.dot(h.astype(jnp.bfloat16), w2_ref[...],
                     preferred_element_type=jnp.float32) + b2_ref[...]
    logits = logits + EPS   # matches F.log_softmax(pred + EPS, ...) exactly

    # Numerically stable log_softmax along the (padded) digit axis. The max
    # is always a real logit and padded exp terms underflow to exactly 0, so
    # the result over the first D lanes equals an unpadded log_softmax.
    m = jnp.max(logits, axis=-1, keepdims=True)
    shifted = logits - m
    lse = jnp.log(jnp.sum(jnp.exp(shifted), axis=-1, keepdims=True))
    logp_full = (shifted - lse).reshape(S, TB, DP)

    # Only the real D digit columns ever leave VMEM (12.8x less writeback).
    logp = logp_full[..., :D]
    logp_ref[...] = logp

    # train=True loss: -(labels * log_probs).sum(-1); labels broadcast over S.
    lab = lab_ref[...]                                        # (TB, D) f32
    loss_ref[...] = -jnp.sum(lab[None, :, :] * logp, axis=-1)  # (S, TB)


def prepare_params(params):
    """One-time param prep: bf16 MXU feeds + lane-padded W2/b2 (pad = -1e9)."""
    w1, b1, w2, b2 = params
    D = w2.shape[1]
    DP = _round_up(D, 128)
    w1b = w1.astype(jnp.bfloat16)
    b1f = b1.reshape(1, -1).astype(jnp.float32)
    w2b = jnp.pad(w2, ((0, 0), (0, DP - D))).astype(jnp.bfloat16)
    b2f = jnp.concatenate(
        [b2.reshape(1, -1).astype(jnp.float32),
         jnp.full((1, DP - D), _NEG_BIG, jnp.float32)], axis=1)
    return w1b, b1f, w2b, b2f


@jax.jit
def decoder_b_forward(zshared, labels, prep):
    """zshared: (S, B, Z) f32, labels: (B, D) f32 (one-hot or soft targets).

    prep = prepare_params(params). Returns (log_probs (S, B, D), loss (S, B))
    exactly as the train=True branch of DecoderB.forward produces per shared
    sample.
    """
    w1b, b1f, w2b, b2f = prep
    S, B, Z = zshared.shape
    H = w1b.shape[1]
    DP = w2b.shape[1]
    D = labels.shape[1]

    TB, Bp = _choose_batch_tile(B, S, H, DP)

    zf = zshared.astype(jnp.float32)
    labf = labels.astype(jnp.float32)
    if Bp != B:
        zf = jnp.pad(zf, ((0, 0), (0, Bp - B), (0, 0)))
        labf = jnp.pad(labf, ((0, Bp - B), (0, 0)))

    logp, loss = pl.pallas_call(
        _decoder_b_kernel,
        out_shape=(
            jax.ShapeDtypeStruct((S, Bp, D), jnp.float32),   # unpadded digits
            jax.ShapeDtypeStruct((S, Bp), jnp.float32),
        ),
        grid=(Bp // TB,),
        in_specs=[
            pl.BlockSpec((S, TB, Z), lambda j: (0, j, 0)),   # zShared tile (f32)
            pl.BlockSpec((Z, H), lambda j: (0, 0)),          # W1 (VMEM-resident)
            pl.BlockSpec((1, H), lambda j: (0, 0)),          # b1 (VMEM-resident)
            pl.BlockSpec((H, DP), lambda j: (0, 0)),         # W2 (VMEM-resident)
            pl.BlockSpec((1, DP), lambda j: (0, 0)),         # b2 (VMEM-resident)
            pl.BlockSpec((TB, D), lambda j: (j, 0)),         # labels tile (unpadded)
        ],
        out_specs=(
            pl.BlockSpec((S, TB, D), lambda j: (0, j, 0)),   # log_probs (D=10)
            pl.BlockSpec((S, TB), lambda j: (0, j)),         # loss (lane-dense)
        ),
        compiler_params=pltpu.CompilerParams(
            dimension_semantics=("parallel",)),
    )(zf, w1b, b1f, w2b, b2f, labf)

    if Bp != B:
        logp = logp[:, :B]
        loss = loss[:, :B]
    return logp, loss


def init_params(key, zshared_dim=10, num_hidden=256, num_digits=10):
    # Deterministic Kaiming-style init (matches the Linear layer shapes of
    # DecoderB.__init__; synthetic, not a checkpoint load).
    k1, k2 = jax.random.split(key)
    w1 = jax.random.normal(k1, (zshared_dim, num_hidden), jnp.float32) * jnp.sqrt(2.0 / zshared_dim)
    b1 = jnp.zeros((1, num_hidden), jnp.float32)
    w2 = jax.random.normal(k2, (num_hidden, num_digits), jnp.float32) * jnp.sqrt(2.0 / num_hidden)
    b2 = jnp.zeros((1, num_digits), jnp.float32)
    return w1, b1, w2, b2


def _reference(zshared, labels, params):
    # Same math in plain JAX with the same bf16 quantization of the MXU
    # inputs that the kernel applies (tolerance covers accumulation-order
    # and bf16 rounding differences).
    w1, b1, w2, b2 = params
    zq = zshared.astype(jnp.bfloat16).astype(jnp.float32)
    w1q = w1.astype(jnp.bfloat16).astype(jnp.float32)
    w2q = w2.astype(jnp.bfloat16).astype(jnp.float32)
    h = jnp.maximum(zq @ w1q + b1.reshape(1, 1, -1), 0.0)
    hq = h.astype(jnp.bfloat16).astype(jnp.float32)
    logits = hq @ w2q + b2.reshape(1, 1, -1) + EPS
    logp = jax.nn.log_softmax(logits, axis=-1)
    loss = -(labels[None] * logp).sum(-1)
    return logp, loss


if __name__ == "__main__":
    key = jax.random.PRNGKey(0)
    kz, kl, kp = jax.random.split(key, 3)

    # --- Small config (single full-batch block), module-consistent shapes ---
    num_samples = 2      # S
    batch = 8            # B
    zshared_dim = 10     # Z
    num_hidden = 32      # H (small for the test; module default is 256)
    num_digits = 10      # D

    params = init_params(kp, zshared_dim, num_hidden, num_digits)
    prep = prepare_params(params)
    zshared = jax.random.normal(kz, (num_samples, batch, zshared_dim), jnp.float32)
    label_idx = jax.random.randint(kl, (batch,), 0, num_digits)
    labels = jax.nn.one_hot(label_idx, num_digits, dtype=jnp.float32)

    log_probs, loss = decoder_b_forward(zshared, labels, prep)
    log_probs = jax.block_until_ready(log_probs)
    loss = jax.block_until_ready(loss)

    logp_ref, loss_ref = _reference(zshared, labels, params)
    assert log_probs.shape == (num_samples, batch, num_digits)
    assert loss.shape == (num_samples, batch)
    assert jnp.allclose(log_probs, logp_ref, atol=2e-2, rtol=2e-2), "log_probs mismatch"
    assert jnp.allclose(loss, loss_ref, atol=2e-2, rtol=2e-2), "loss mismatch"

    # --- Larger config exercising the multi-step tiled grid path (>=2 steps) ---
    S2, B2, H2 = 2, 512, 256
    params2 = init_params(kp, zshared_dim, H2, num_digits)
    prep2 = prepare_params(params2)
    z2 = jax.random.normal(kz, (S2, B2, zshared_dim), jnp.float32)
    lab_idx2 = jax.random.randint(kl, (B2,), 0, num_digits)
    labels2 = jax.nn.one_hot(lab_idx2, num_digits, dtype=jnp.float32)

    logp2, loss2 = decoder_b_forward(z2, labels2, prep2)
    logp2 = jax.block_until_ready(logp2)
    loss2 = jax.block_until_ready(loss2)

    logp2_ref, loss2_ref = _reference(z2, labels2, params2)
    assert logp2.shape == (S2, B2, num_digits)
    assert loss2.shape == (S2, B2)
    assert jnp.allclose(logp2, logp2_ref, atol=2e-2, rtol=2e-2), "tiled log_probs mismatch"
    assert jnp.allclose(loss2, loss2_ref, atol=2e-2, rtol=2e-2), "tiled loss mismatch"

    # TODO(synk): probtorch.Trace / p.normal prior registration (and the
    # train=False argmax-accuracy loss branch) have no Pallas equivalent;
    # only the deterministic decoder + train-loss hot path is ported.
    print("KERNEL_OK")
</pallas_src>

<mosaic_0001>
module attributes {stable_mosaic.version = 11 : i64} {
  func.func @_decoder_b_kernel(%arg0: i32, %arg1: memref<2x8x10xf32, #tpu.memory_space<vmem>>, %arg2: memref<10x32xbf16, #tpu.memory_space<vmem>>, %arg3: memref<1x32xf32, #tpu.memory_space<vmem>>, %arg4: memref<32x128xbf16, #tpu.memory_space<vmem>>, %arg5: memref<1x128xf32, #tpu.memory_space<vmem>>, %arg6: memref<8x10xf32, #tpu.memory_space<vmem>>, %arg7: memref<2x8x10xf32, #tpu.memory_space<vmem>>, %arg8: memref<2x8xf32, #tpu.memory_space<vmem>>) attributes {dimension_semantics = [#tpu.dimension_semantics<parallel>], iteration_bounds = array<i64: 1>, scalar_prefetch = 0 : i64, scratch_operands = 0 : i64, tpu.core_type = #tpu.core_type<tc>, window_params = [{transform_indices = @transform_0, window_bounds = array<i64: 2, 8, 10>}, {pipeline_mode = #tpu.pipeline_mode<synchronous>, transform_indices = @transform_1, window_bounds = array<i64: 10, 32>}, {pipeline_mode = #tpu.pipeline_mode<synchronous>, transform_indices = @transform_2, window_bounds = array<i64: 1, 32>}, {pipeline_mode = #tpu.pipeline_mode<synchronous>, transform_indices = @transform_3, window_bounds = array<i64: 32, 128>}, {pipeline_mode = #tpu.pipeline_mode<synchronous>, transform_indices = @transform_4, window_bounds = array<i64: 1, 128>}, {transform_indices = @transform_5, window_bounds = array<i64: 8, 10>}, {transform_indices = @transform_6, window_bounds = array<i64: 2, 8, 10>}, {transform_indices = @transform_7, window_bounds = array<i64: 2, 8>}]} {
    %c0 = arith.constant 0 : index
    %c0_0 = arith.constant 0 : index
    %c0_1 = arith.constant 0 : index
    %0 = vector.load %arg1[%c0, %c0_0, %c0_1] : memref<2x8x10xf32, #tpu.memory_space<vmem>>, vector<2x8x10xf32>
    %1 = arith.truncf %0 : vector<2x8x10xf32> to vector<2x8x10xbf16>
    %2 = vector.shape_cast %1 : vector<2x8x10xbf16> to vector<16x10xbf16>
    %c0_2 = arith.constant 0 : index
    %c0_3 = arith.constant 0 : index
    %3 = vector.load %arg2[%c0_2, %c0_3] : memref<10x32xbf16, #tpu.memory_space<vmem>>, vector<10x32xbf16>
    %cst = arith.constant dense<0.000000e+00> : vector<16x32xf32>
    %4 = tpu.matmul %2, %3, %cst {dimension_numbers = #tpu.dot_dimension_numbers<[1], [0], [0], [1], [0, 0, 1, 1], [], []>} : vector<16x10xbf16>, vector<10x32xbf16>, vector<16x32xf32> -> vector<16x32xf32>
    %c0_4 = arith.constant 0 : index
    %c0_5 = arith.constant 0 : index
    %5 = vector.load %arg3[%c0_4, %c0_5] : memref<1x32xf32, #tpu.memory_space<vmem>>, vector<1x32xf32>
    %6 = vector.broadcast %5 : vector<1x32xf32> to vector<16x32xf32>
    %7 = arith.addf %4, %6 : vector<16x32xf32>
    %cst_6 = arith.constant 0.000000e+00 : f32
    %8 = vector.broadcast %cst_6 : f32 to vector<16x32xf32>
    %9 = arith.maximumf %7, %8 : vector<16x32xf32>
    %10 = arith.truncf %9 : vector<16x32xf32> to vector<16x32xbf16>
    %c0_7 = arith.constant 0 : index
    %c0_8 = arith.constant 0 : index
    %11 = vector.load %arg4[%c0_7, %c0_8] : memref<32x128xbf16, #tpu.memory_space<vmem>>, vector<32x128xbf16>
    %cst_9 = arith.constant dense<0.000000e+00> : vector<16x128xf32>
    %12 = tpu.matmul %10, %11, %cst_9 {dimension_numbers = #tpu.dot_dimension_numbers<[1], [0], [0], [1], [0, 0, 1, 1], [], []>} : vector<16x32xbf16>, vector<32x128xbf16>, vector<16x128xf32> -> vector<16x128xf32>
    %c0_10 = arith.constant 0 : index
    %c0_11 = arith.constant 0 : index
    %13 = vector.load %arg5[%c0_10, %c0_11] : memref<1x128xf32, #tpu.memory_space<vmem>>, vector<1x128xf32>
    %14 = vector.broadcast %13 : vector<1x128xf32> to vector<16x128xf32>
    %15 = arith.addf %12, %14 : vector<16x128xf32>
    %cst_12 = arith.constant 9.99999971E-10 : f32
    %16 = vector.broadcast %cst_12 : f32 to vector<16x128xf32>
    %17 = arith.addf %15, %16 : vector<16x128xf32>
    %cst_13 = arith.constant dense<0xFF800000> : vector<16xf32>
    %18 = vector.multi_reduction <maximumf>, %17, %cst_13 [1] : vector<16x128xf32> to vector<16xf32>
    %19 = vector.shape_cast %18 : vector<16xf32> to vector<16x1xf32>
    %20 = vector.broadcast %19 : vector<16x1xf32> to vector<16x128xf32>
    %21 = arith.subf %17, %20 : vector<16x128xf32>
    %22 = math.exp %21 : vector<16x128xf32>
    %cst_14 = arith.constant dense<0.000000e+00> : vector<16xf32>
    %23 = vector.multi_reduction <add>, %22, %cst_14 [1] : vector<16x128xf32> to vector<16xf32>
    %24 = vector.shape_cast %23 : vector<16xf32> to vector<16x1xf32>
    %25 = math.log %24 : vector<16x1xf32>
    %26 = vector.broadcast %25 : vector<16x1xf32> to vector<16x128xf32>
    %27 = arith.subf %21, %26 : vector<16x128xf32>
    %28 = vector.shape_cast %27 : vector<16x128xf32> to vector<2x8x128xf32>
    %29 = vector.extract_strided_slice %28 {offsets = [0, 0, 0], sizes = [2, 8, 10], strides = [1, 1, 1]} : vector<2x8x128xf32> to vector<2x8x10xf32>
    %c0_15 = arith.constant 0 : index
    %c0_16 = arith.constant 0 : index
    %c0_17 = arith.constant 0 : index
    %30 = vector.load %arg7[%c0_15, %c0_16, %c0_17] : memref<2x8x10xf32, #tpu.memory_space<vmem>>, vector<2x8x10xf32>
    tpu.vector_store %arg7[%c0_15, %c0_16, %c0_17], %29 {strides = array<i32>} : memref<2x8x10xf32, #tpu.memory_space<vmem>>, vector<2x8x10xf32>,
    %c0_18 = arith.constant 0 : index
    %c0_19 = arith.constant 0 : index
    %31 = vector.load %arg6[%c0_18, %c0_19] : memref<8x10xf32, #tpu.memory_space<vmem>>, vector<8x10xf32>
    %32 = vector.shape_cast %31 : vector<8x10xf32> to vector<1x8x10xf32>
    %33 = vector.broadcast %32 : vector<1x8x10xf32> to vector<2x8x10xf32>
    %34 = arith.mulf %33, %29 : vector<2x8x10xf32>
    %cst_20 = arith.constant dense<0.000000e+00> : vector<2x8xf32>
    %35 = vector.multi_reduction <add>, %34, %cst_20 [2] : vector<2x8x10xf32> to vector<2x8xf32>
    %cst_21 = arith.constant 0.000000e+00 : f32
    %36 = vector.broadcast %cst_21 : f32 to vector<2x8xf32>
    %37 = arith.subf %36, %35 : vector<2x8xf32>
    %c0_22 = arith.constant 0 : index
    %c0_23 = arith.constant 0 : index
    %38 = vector.load %arg8[%c0_22, %c0_23] : memref<2x8xf32, #tpu.memory_space<vmem>>, vector<2x8xf32>
    tpu.vector_store %arg8[%c0_22, %c0_23], %37 {strides = array<i32>} : memref<2x8xf32, #tpu.memory_space<vmem>>, vector<2x8xf32>,
    return
  }
  func.func @transform_0(%arg0: i32) -> (i32, i32, i32) {
    %c0_i32 = arith.constant 0 : i32
    %c0_i32_0 = arith.constant 0 : i32
    %c0_i32_1 = arith.constant 0 : i32
    return %c0_i32, %arg0, %c0_i32_0 : i32, i32, i32
  }
  func.func @transform_1(%arg0: i32) -> (i32, i32) {
    %c0_i32 = arith.constant 0 : i32
    %c0_i32_0 = arith.constant 0 : i32
    %c0_i32_1 = arith.constant 0 : i32
    return %c0_i32, %c0_i32_0 : i32, i32
  }
  func.func @transform_2(%arg0: i32) -> (i32, i32) {
    %c0_i32 = arith.constant 0 : i32
    %c0_i32_0 = arith.constant 0 : i32
    %c0_i32_1 = arith.constant 0 : i32
    return %c0_i32, %c0_i32_0 : i32, i32
  }
  func.func @transform_3(%arg0: i32) -> (i32, i32) {
    %c0_i32 = arith.constant 0 : i32
    %c0_i32_0 = arith.constant 0 : i32
    %c0_i32_1 = arith.constant 0 : i32
    return %c0_i32, %c0_i32_0 : i32, i32
  }
  func.func @transform_4(%arg0: i32) -> (i32, i32) {
    %c0_i32 = arith.constant 0 : i32
    %c0_i32_0 = arith.constant 0 : i32
    %c0_i32_1 = arith.constant 0 : i32
    return %c0_i32, %c0_i32_0 : i32, i32
  }
  func.func @transform_5(%arg0: i32) -> (i32, i32) {
    %c0_i32 = arith.constant 0 : i32
    %c0_i32_0 = arith.constant 0 : i32
    return %arg0, %c0_i32 : i32, i32
  }
  func.func @transform_6(%arg0: i32) -> (i32, i32, i32) {
    %c0_i32 = arith.constant 0 : i32
    %c0_i32_0 = arith.constant 0 : i32
    %c0_i32_1 = arith.constant 0 : i32
    return %c0_i32, %arg0, %c0_i32_0 : i32, i32, i32
  }
  func.func @transform_7(%arg0: i32) -> (i32, i32) {
    %c0_i32 = arith.constant 0 : i32
    %c0_i32_0 = arith.constant 0 : i32
    return %c0_i32, %arg0 : i32, i32
  }
}

</mosaic_0001>

<bundles_post_ra>
// kernel: decoder_b_forward.1
= control target key start
LH: loop header
LB: loop body
LE: loop exit
PB: predicated region body
PF: predicated region fallthrough
CT: control target
= control target key end

     0   :  { %13 = vsyncpa [#allocation3], 0  ;;  %s531_s0 = inlined_call_operand.hbm [shape: f32[2,8,10], index: 0, kind: input, shape index: {}]   ;;  %s532_s1 = inlined_call_operand.hbm [shape: bf16[10,32], index: 1, kind: input, shape index: {}]   ;;  %s533_s2 = inlined_call_operand.vmem [shape: f32[1,32], index: 2, kind: input, shape index: {}]   ;;  %s534_s3 = inlined_call_operand.hbm [shape: bf16[32,128], index: 3, kind: input, shape index: {}]   ;;  %s535_s4 = inlined_call_operand.vmem [shape: f32[1,128], index: 4, kind: input, shape index: {}]   ;;  %s536_s5 = inlined_call_operand.hbm [shape: f32[8,10], index: 5, kind: input, shape index: {}]   ;;  %s537_s6 = inlined_call_operand.hbm [shape: f32[2,8,10], index: 6, kind: output, shape index: {0}]   ;;  %s538_s7 = inlined_call_operand.hbm [shape: f32[2,8], index: 7, kind: output, shape index: {1}]  }
   0x1   :  { %14 = vsyncpa [#allocation6], 0 }
   0x2   :  { %15 = vsyncpa [#allocation9], 0 }
   0x3   :  { %16 = vsyncpa [#allocation4], 0  ;;  %s35_s26 = sshll.u32 %s532_s1, 4  ;;  %s36_s26 = int_to_ptr.hbm [resolvable:$true] %s35_s26 }
   0x4   :  { %17 = vsyncpa [#allocation12], 0  ;;  %s446_s27 = smov [#allocation5]   ;;  %s22_s8 = sshll.u32 %s531_s0, 4  ;;  %s23_s8 = int_to_ptr.hbm [resolvable:$true] %s22_s8 }
   0x5   :  { %s37_s28 = sshll.u32 %s446_s27, 4  ;;  %s447_s9 = smov 64   ;;  %s38_s28 = int_to_ptr.vmem [resolvable:$true] %s37_s28 }
   0x6   :  { %s448_s10 = smov 4   ;;  %s449_s11 = smov [#allocation2]  }
   0x7   :  { %43 = dma.hbm_to_vmem [thread:$0]  %s36_s26, 128, %s38_s28, [#allocation6], %s447_s9, %s447_s9, %s448_s10  }
   0x8   :  { %s24_s12 = sshll.u32 %s449_s11, 4  ;;  %s450_s13 = smov 128   ;;  %s25_s12 = int_to_ptr.vmem [resolvable:$true] %s24_s12 }
   0x9   :  { %s451_s14 = smov 8   ;;  %s50_s16 = sshll.u32 %s534_s3, 4  ;;  %s51_s16 = int_to_ptr.hbm [resolvable:$true] %s50_s16 }
   0xa   :  { %30 = dma.hbm_to_vmem [thread:$0]  %s23_s8, 256, %s25_s12, [#allocation3], %s450_s13, %s450_s13, %s451_s14  }
   0xb   :  { %s452_s17 = smov [#allocation7]   ;;  %s66_s20 = sshll.u32 %s536_s5, 4  ;;  %s67_s20 = int_to_ptr.hbm [resolvable:$true] %s66_s20 }
   0xc   :  { %s52_s0 = sshll.u32 %s452_s17, 4  ;;  %s453_s21 = smov [#allocation8]   ;;  %s53_s0 = int_to_ptr.vmem [resolvable:$true] %s52_s0 }
   0xd   :  { %58 = dma.hbm_to_vmem [thread:$0]  %s51_s16, 256, %s53_s0, [#allocation6], %s447_s9, %s447_s9, %s448_s10  }
   0xe   :  { %s68_s22 = sshll.u32 %s453_s21, 4  ;;  %s69_s22 = int_to_ptr.vmem [resolvable:$true] %s68_s22 }
   0xf   :  { %71 = dma.hbm_to_vmem [thread:$0]  %s67_s20, 128, %s69_s22, [#allocation9]  }
  0x10   :  { %436 = dma.done.wait [#allocation3], 256  }
  0x11   :  { %437 = vsyncadd [#allocation3], 4294967040 }
  0x12   :  { %438 = dma.done.wait [#allocation6], 384  }
  0x13   :  { %439 = vsyncadd [#allocation6], 4294966912 }
  0x14   :  { %440 = dma.done.wait [#allocation9], 128  }
  0x15   :  { %441 = vsyncadd [#allocation9], 4294967168  ;;  %v257_v0 = vld [vmem:[#allocation5] sm:$0xf]  ;;  %v269_v1 = vld [vmem:[#allocation5] sm:$0x10]  ;;  %v209_v50 = vlaneseq }
  0x16   :  { %vm113_vm0 = vcmask 1044480   ;;  %v89_v2 = vld [vmem:[#allocation2] sm:$0xff]  ;;  %v258_v3 = vor.u32 %v269_v1, %v257_v0  ;;  %v90_v4 = vld [vmem:[#allocation2 + $0x8] sm:$0xff]  ;;  %vm109_vm1 = vcmask 80896   ;;  %v270_v12 = vld [vmem:[#allocation7] sm:$0xff]  ;;  %vm154_vm2 = vcmask 261120  }
  0x17   :  { %v91_v5 = vpack.c.bf16 %v89_v2, %v89_v2  ;;  %v92_v6 = vpack.c.bf16 %v90_v4, %v90_v4  ;;  %v271_v11 = vld [vmem:[#allocation7 + $0x8] sm:$0xff]  ;;  %v196_v40 = vld [vmem:[#allocation8] sm:$0xff]  ;;  %s224_s27 = sshll.u32 %s537_s6, 4  ;;  %v210_v51 = vand.u32 127, %v209_v50  ;;  %s455_s6 = smov [#allocation11]   ;;  %vm213_vm3 = vcmask 1041409   ;;  %s225_s27 = int_to_ptr.hbm [resolvable:$true] %s224_s27 }
  0x18   :  { %v115_v7 = vsel %vm113_vm0, %v258_v3, 0  ;;  %164 = vmatpush.bf16.msra.mxu1 %v271_v11  ;;  %v282_v14 = vld [vmem:[%s533_s2] ss:$0 sm:$0xff]  ;;  %s454_s2 = smov [#allocation10]   ;;  %s236_s28 = sshll.u32 %s455_s6, 4  ;;  %vm216_vm4 = vcmask 58368   ;;  %s237_s28 = int_to_ptr.vmem [resolvable:$true] %s236_s28 }
  0x19   :  { %v101_v8 = vunpack.c.l.b16 %v91_v5  ;;  %124 = vmatpush.bf16.msra.mxu0 %v115_v7  ;;  %v102_v9 = vunpack.c.l.b16 %v92_v6  ;;  %v283_v21 = vld [vmem:[%s535_s4] ss:$0 sm:$0xff]  ;;  %s222_s4 = sshll.u32 %s454_s2, 4  ;;  %s238_s8 = sshll.u32 %s538_s7, 4  ;;  %s223_s4 = int_to_ptr.vmem [resolvable:$true] %s222_s4  ;;  %s239_s8 = int_to_ptr.hbm [resolvable:$true] %s238_s8 }
  0x1b   :  { %v103_v10 = vpack.c.b16 %v102_v9, %v101_v8 }
  0x1c   :  { %165 = vmatpush.bf16.msra.mxu1 %v270_v12 }
  0x1d   :  { %259 = vmatmul.msk.bf16.vlgmr.msra.gmra.mxu0 %vm109_vm1, %v103_v10 }
  0x9a   :  { %v126_v13 = vpop.f32.mrf.mxu0 }
  0x9b   :  { %v127_v15 = vadd.f32 %v282_v14, %v126_v13 }
  0x9d   :  { %v131_v18 = vmax.f32 %v127_v15, 0.0 }
  0xa2   :  { %v128_v16 = vpop.f32.mrf.mxu0 }
  0xa3   :  { %v129_v17 = vadd.f32 %v282_v14, %v128_v16 }
  0xa5   :  { %v132_v19 = vmax.f32 %v129_v17, 0.0 }
  0xa7   :  { %v133_v20 = vpack.c.bf16 %v132_v19, %v131_v18 }
  0xa9   :  { %268 = vmatmul.msk.bf16.vlgmr.msra.gmra.mxu1 %vm154_vm2, %v133_v20 }
 0x126   :  { %v167_v22 = vpop.f32.mrf.mxu1 }
 0x127   :  { %v168_v23 = vadd.f32 %v283_v21, %v167_v22 }
 0x129   :  { %v172_v24 = vadd.f32 1e-09, %v168_v23 }
 0x12b   :  { %174 = vmax.xlane.f32.xlu0 %v172_v24 }
 0x12e   :  { %v169_v25 = vpop.f32.mrf.mxu1 }
 0x12f   :  { %v170_v26 = vadd.f32 %v283_v21, %v169_v25 }
 0x131   :  { %v173_v27 = vadd.f32 1e-09, %v170_v26 }
 0x133   :  { %176 = vmax.xlane.f32.xlu0 %v173_v27 }
 0x19e   :  { %v175_v28 = vpop.xlane.xlu0 %174 }
 0x19f   :  { %v178_v29 = vsub.f32 %v172_v24, %v175_v28 }
 0x1a1   :  { %v180_v30 = vmul.f32 1.442695, %v178_v29 }
 0x1a3   :  { %284 = vpow2.f32 %v180_v30 }
 0x1a6   :  { %v177_v31 = vpop.xlane.xlu0 %176 }
 0x1a7   :  { %v179_v32 = vsub.f32 %v173_v27, %v177_v31 }
 0x1a9   :  { %v285_v33 = vpop.eup %284  ;;  %v182_v34 = vmul.f32 1.442695, %v179_v32 }
 0x1aa   :  { %184 = vadd.xlane.f32.xlu1 %v285_v33 }
 0x1ab   :  { %286 = vpow2.f32 %v182_v34 }
 0x1b1   :  { %v287_v35 = vpop.eup %286 }
 0x1b2   :  { %186 = vadd.xlane.f32.xlu1 %v287_v35 }
 0x21d   :  { %v185_v36 = vpop.xlane.xlu1 %184 }
 0x21e   :  { %288 = vlog2.f32 %v185_v36 }
 0x224   :  { %v289_v37 = vpop.eup %288 }
 0x225   :  { %v189_v38 = vmul.f32 0.6931472, %v289_v37  ;;  %v187_v39 = vpop.xlane.xlu1 %186 }
 0x226   :  { %290 = vlog2.f32 %v187_v39 }
 0x227   :  { %v192_v41 = vsub.f32 %v178_v29, %v189_v38 }
 0x229   :  { %v197_v42 = vmul.f32 %v196_v40, %v192_v41  ;;  %194 = vst.msk [vmem:[#allocation10] sm:$0xff] %vm109_vm1, %v192_v41 }
 0x22b   :  { %v199_v43 = vsel %vm109_vm1, %v197_v42, 0.0 }
 0x22c   :  { %v291_v44 = vpop.eup %290  ;;  %200 = vadd.xlane.f32.xlu2 %v199_v43 }
 0x22d   :  { %v191_v45 = vmul.f32 0.6931472, %v291_v44 }
 0x22f   :  { %v193_v46 = vsub.f32 %v179_v32, %v191_v45 }
 0x231   :  { %195 = vst.msk [vmem:[#allocation10 + $0x8] sm:$0xff] %vm109_vm1, %v193_v46  ;;  %v198_v47 = vmul.f32 %v196_v40, %v193_v46 }
 0x232   :  { %230 = dma.vmem_to_hbm [thread:$0]  %s223_s4, 256, %s225_s27, [#allocation4], %s450_s13, %s450_s13, %s451_s14  }
 0x233   :  { %v202_v48 = vsel %vm109_vm1, %v198_v47, 0.0 }
 0x234   :  { %203 = vadd.xlane.f32.xlu2 %v202_v48 }
 0x29f   :  { %v201_v49 = vpop.xlane.xlu2 %200 }
 0x2a0   :  { %v205_v52 = vsub.f32 0.0, %v201_v49 }
 0x2a2   :  { %v211_v55 = vperm.slane %v205_v52, %v210_v51 }
 0x2a7   :  { %v204_v53 = vpop.xlane.xlu2 %203 }
 0x2a8   :  { %v206_v54 = vsub.f32 0.0, %v204_v53 }
 0x2aa   :  { %v212_v56 = vperm.slane %v206_v54, %v210_v51 }
 0x2ac   :  { %v214_v57 = vsel %vm213_vm3, %v212_v56, %v211_v55 }
 0x2ad   :  { %217 = vst.msk [vmem:[#allocation11] sm:$0x3] %vm216_vm4, %v214_v57 }
 0x2ae   :  { %241 = dma.vmem_to_hbm [thread:$0]  %s237_s28, 32, %s239_s8, [#allocation12]  }
 0x2af   :  { %442 = dma.done.wait [#allocation4], 256  }
 0x2b0   :  { %443 = vsyncadd [#allocation4], 4294967040 }
 0x2b1   :  { %444 = dma.done.wait [#allocation12], 32  }
 0x2b2   :  { %445 = vsyncadd [#allocation12], 4294967264 }
 0x2b3   :  { %250 = vsyncpa [#allocation3], 1 }
 0x2b4   :  { %251 = vsyncpa [#allocation6], 1 }
 0x2b5   :  { %252 = vsyncpa [#allocation9], 1 }
 0x2b6   :  { %253 = vsyncpa [#allocation4], 1 }
 0x2b7   :  { %254 = vsyncpa [#allocation12], 1 }

</bundles_post_ra>
